<compile_context>
chip_gen: v7x
topology: tpu7x:2x2x1
jax: 0.10.0
libtpu: 0.0.40
codegen_flags: <defaults>
</compile_context>

<pallas_src>
import math

import jax
import jax.numpy as jnp
from jax import lax
from jax.experimental import pallas as pl
from jax.experimental.pallas import tpu as pltpu


def _round_up(x, m):
    return -(-x // m) * m


def _vmem_capacity_bytes():
    try:
        info = pltpu.get_tpu_info()
        cap = getattr(info, "vmem_capacity_bytes", None)
        if cap:
            return int(cap)
    except Exception:
        pass
    return 128 * 1024 * 1024  # v5e/v6e default; v7x reports 64 MiB via the query


def _plan(B, T, S, D, in_itemsize, out_itemsize, src_chunk=None):
    """Pick (bt, tq, ts) + padded dims so the per-step working set fits VMEM."""
    cap = _vmem_capacity_bytes()
    budget = int(cap * 0.70)
    vmem_limit = min(int(cap * 0.85), 112 * 1024 * 1024)

    # Batch packing: never escalate past 8 rows per step (review item); pad B instead.
    if B <= 8:
        bt, B_pad, D_pad, s_align = B, B, D, 1
    else:
        bt = 8
        B_pad = _round_up(B, bt)
        lane_q = 128 // math.gcd(bt, 128)  # 16 for bt=8
        D_pad = D if (bt * D) % 128 == 0 else _round_up(D, lane_q)
        s_align = lane_q

    t8 = _round_up(T, 8)
    tq_cands = sorted({min(c, t8) for c in (256, 128, 64, 32, 16, 8)}, reverse=True)

    if src_chunk is None:
        ts_cands = (512, 256, 128)
    else:
        ts_cands = (_round_up(int(src_chunk), 8),)

    def resolve_s(ts_cand):
        if ts_cand >= S:                       # single chunk covers all of S
            sp = _round_up(S, s_align)
            return sp, sp
        step = (ts_cand * s_align) // math.gcd(ts_cand, s_align)
        sp = _round_up(S, step)
        return sp, ts_cand

    def est(tq, ts, S_pad):
        ns = S_pad // ts
        return (bt * tq * D_pad * in_itemsize * 2          # source block (double buffered)
                + bt * ts * D_pad * in_itemsize * 2        # memory chunk block
                + 2 * D_pad * D_pad * in_itemsize * 2      # linear_out weight block
                + tq * bt * D_pad * out_itemsize * 2       # attn_h out block
                + tq * bt * S_pad * out_itemsize * 2       # align out block
                + ns * bt * tq * max(ts, 128) * 4          # masked-score scratch
                + bt * tq * D_pad * 4                      # context accumulator
                + 2 * bt * tq * 128 * 4)                   # running max / denom

    choice = None
    for tq in tq_cands:
        for ts_cand in ts_cands:
            S_pad, ts = resolve_s(ts_cand)
            if est(tq, ts, S_pad) <= budget:
                choice = (tq, ts, S_pad)
                break
        if choice is not None:
            break
    if choice is None:  # nothing fits the heuristic budget: take the smallest tiles
        S_pad, ts = resolve_s(ts_cands[-1])
        choice = (tq_cands[-1], ts, S_pad)

    tq, ts, S_pad = choice
    T_pad = _round_up(T, tq)
    return dict(bt=bt, tq=tq, ts=ts, B_pad=B_pad, T_pad=T_pad, S_pad=S_pad,
                D_pad=D_pad, vmem_limit=vmem_limit)


def _make_kernel(bt, D_pad, S_pad, ts, ns, mm_dtype):
    """Fused attention kernel. Grid = (batch_tiles, query_tiles, src_chunks)."""

    def kernel(lens_ref,      # SMEM scalar prefetch: [B_pad] int32
               src_ref,       # [bt, tq, D_pad]  query block (constant over s)
               mem_ref,       # [bt, ts, D_pad]  memory chunk
               w_ref,         # [D_pad, 2*D_pad] linear_out weight
               attn_ref,      # out: [tq, bt*D_pad] slice of [T_pad, B_pad*D_pad]
               align_ref,     # out: [tq, bt*S_pad] slice of [T_pad, B_pad*S_pad]
               score_scr,     # [ns, bt, tq, ts] f32 masked scores (for exact align)
               m_scr,         # [bt, tq, 1] f32 running max
               l_scr,         # [bt, tq, 1] f32 running denominator
               acc_scr):      # [bt, tq, D_pad] f32 running context
        b = pl.program_id(0)
        s = pl.program_id(2)
        tq = src_ref.shape[1]

        @pl.when(s == 0)
        def _init():
            m_scr[...] = jnp.full(m_scr.shape, -jnp.inf, dtype=jnp.float32)
            l_scr[...] = jnp.zeros(l_scr.shape, dtype=jnp.float32)
            acc_scr[...] = jnp.zeros(acc_scr.shape, dtype=jnp.float32)

        # Column indices of this memory chunk; hoisted out of the batch-row loop.
        col = s * ts + lax.broadcasted_iota(jnp.int32, (tq, ts), 1)

        # bt <= 8 by construction: static unroll keeps every store lane-static.
        for i in range(bt):
            src = src_ref[i].astype(mm_dtype)            # [tq, D_pad]
            mem = mem_ref[i].astype(mm_dtype)            # [ts, D_pad]
            length = lens_ref[b * bt + i]

            # scores[t, k] = <q_t, m_k>; contract last dims (no explicit mem.T).
            scores = lax.dot_general(src, mem, (((1,), (1,)), ((), ())),
                                     preferred_element_type=jnp.float32)  # [tq, ts] f32
            # Length mask (torch masked_fill_(-inf)); padded columns are masked too
            # because memory_lengths <= original S.
            scores = jnp.where(col < length, scores, -jnp.inf)
            score_scr[s, i] = scores                     # kept for the exact align export

            # Online softmax (running max / denominator) in f32.
            m_prev = m_scr[i]                            # [tq, 1]
            m_new = jnp.maximum(m_prev, jnp.max(scores, axis=-1, keepdims=True))
            alpha = jnp.exp(m_prev - m_new)
            p = jnp.exp(scores - m_new)                  # [tq, ts]
            l_scr[i] = alpha * l_scr[i] + jnp.sum(p, axis=-1, keepdims=True)
            acc_scr[i] = alpha * acc_scr[i] + jnp.dot(
                p.astype(mm_dtype), mem, preferred_element_type=jnp.float32)
            m_scr[i] = m_new

        @pl.when(s == ns - 1)
        def _finalize():
            # torch: out = cat([c, q]) @ W^T -> contract each half's input dim.
            wc = w_ref[:, :D_pad].astype(mm_dtype)       # acts on the context
            wq = w_ref[:, D_pad:].astype(mm_dtype)       # acts on the query
            for i in range(bt):
                inv_l = 1.0 / l_scr[i]                   # exact (no approx reciprocal)
                ctx = acc_scr[i] * inv_l                 # [tq, D_pad] f32
                src = src_ref[i].astype(mm_dtype)
                h = jnp.tanh(
                    lax.dot_general(ctx.astype(mm_dtype), wc, (((1,), (1,)), ((), ())),
                                    preferred_element_type=jnp.float32)
                    + lax.dot_general(src, wq, (((1,), (1,)), ((), ())),
                                      preferred_element_type=jnp.float32))
                attn_ref[:, i * D_pad:(i + 1) * D_pad] = h.astype(attn_ref.dtype)

                # Exact softmax export: re-normalize the stored masked scores with
                # the final max / denominator (static loop -> lane-static stores).
                m_fin = m_scr[i]
                for c in range(ns):
                    al = jnp.exp(score_scr[c, i] - m_fin) * inv_l
                    lo = i * S_pad + c * ts
                    align_ref[:, lo:lo + ts] = al.astype(align_ref.dtype)

    return kernel


def global_attention_dot(source, memory_bank, memory_lengths=None,
                         linear_out_weight=None, *, mxu_bf16=True, src_chunk=None):
    """
    Fused GlobalAttention (attn_type='dot') forward.

    source:            [B, T, D] (or [B, D] for one-step decode)
    memory_bank:       [B, S, D]
    memory_lengths:    [B] int (optional; None = attend to all S positions)
    linear_out_weight: [D, 2D] (torch nn.Linear(2D, D, bias=False).weight)
    mxu_bf16:          feed the MXU bf16 operands with f32 accumulation (fast path,
                       matches XLA's default TPU matmul precision); False = exact f32.
    src_chunk:         override the memory chunk length (multiple of 8); testing hook.

    Returns (attn_h [T, B, D], align [T, B, S]) — or ([B, D], [B, S]) for one-step.
    """
    one_step = source.ndim == 2
    if one_step:
        source = source[:, None, :]

    B, T, D = source.shape
    _, S, _ = memory_bank.shape

    if memory_lengths is None:
        lengths = jnp.full((B,), S, dtype=jnp.int32)
    else:
        lengths = jnp.minimum(memory_lengths.astype(jnp.int32), S)

    out_dtype = source.dtype
    mm_dtype = jnp.bfloat16 if (mxu_bf16 or source.dtype == jnp.bfloat16) else source.dtype

    plan = _plan(B, T, S, D, jnp.dtype(source.dtype).itemsize,
                 jnp.dtype(out_dtype).itemsize, src_chunk)
    bt, tq, ts = plan["bt"], plan["tq"], plan["ts"]
    B_pad, T_pad, S_pad, D_pad = plan["B_pad"], plan["T_pad"], plan["S_pad"], plan["D_pad"]
    nb, nt, ns = B_pad // bt, T_pad // tq, S_pad // ts

    # Zero-pad to tile multiples: padded source columns are excluded by the length
    # mask; padded target rows / batch rows / feature dims are sliced away below.
    src_p = jnp.pad(source, ((0, B_pad - B), (0, T_pad - T), (0, D_pad - D)))
    mem_p = jnp.pad(memory_bank, ((0, B_pad - B), (0, S_pad - S), (0, D_pad - D)))
    if B_pad != B:
        lengths = jnp.pad(lengths, (0, B_pad - B), constant_values=1)

    w = linear_out_weight
    if D_pad != D:
        w_p = jnp.zeros((D_pad, 2 * D_pad), dtype=w.dtype)
        w = w_p.at[:D, :D].set(w[:, :D]).at[:D, D_pad:D_pad + D].set(w[:, D:])

    kernel = _make_kernel(bt, D_pad, S_pad, ts, ns, mm_dtype)

    grid_spec = pltpu.PrefetchScalarGridSpec(
        num_scalar_prefetch=1,
        grid=(nb, nt, ns),
        in_specs=[
            pl.BlockSpec((bt, tq, D_pad), lambda b, t, s, lens: (b, t, 0)),   # source
            pl.BlockSpec((bt, ts, D_pad), lambda b, t, s, lens: (b, s, 0)),   # memory chunk
            pl.BlockSpec((D_pad, 2 * D_pad), lambda b, t, s, lens: (0, 0)),   # linear_out W
        ],
        out_specs=[
            pl.BlockSpec((tq, bt * D_pad), lambda b, t, s, lens: (t, b)),     # attn_h (flat)
            pl.BlockSpec((tq, bt * S_pad), lambda b, t, s, lens: (t, b)),     # align  (flat)
        ],
        scratch_shapes=[
            pltpu.VMEM((ns, bt, tq, ts), jnp.float32),    # masked scores per chunk
            pltpu.VMEM((bt, tq, 1), jnp.float32),         # running max
            pltpu.VMEM((bt, tq, 1), jnp.float32),         # running denominator
            pltpu.VMEM((bt, tq, D_pad), jnp.float32),     # context accumulator
        ],
    )

    # Prefer a batch-axis core split (avoids both cores re-fetching the same memory
    # chunks on v7x); parallel axes stay a prefix of the grid.
    if nb > 1:
        dims = ("parallel", "arbitrary", "arbitrary")
    else:
        dims = ("parallel", "parallel", "arbitrary")

    attn_flat, align_flat = pl.pallas_call(
        kernel,
        out_shape=(
            jax.ShapeDtypeStruct((T_pad, B_pad * D_pad), out_dtype),
            jax.ShapeDtypeStruct((T_pad, B_pad * S_pad), out_dtype),
        ),
        grid_spec=grid_spec,
        compiler_params=pltpu.CompilerParams(
            dimension_semantics=dims,
            vmem_limit_bytes=plan["vmem_limit"],
        ),
    )(lengths, src_p, mem_p, w)

    # Free reshapes + slices to the PyTorch output layout.
    attn_h = attn_flat.reshape(T_pad, B_pad, D_pad)[:T, :B, :D]
    align = align_flat.reshape(T_pad, B_pad, S_pad)[:T, :B, :S]
    if one_step:
        return attn_h[0], align[0]
    return attn_h, align


def _reference(source, memory_bank, memory_lengths, linear_out_weight):
    """Pure-JAX reference mirroring the PyTorch forward (attn_type='dot')."""
    hi = jax.lax.Precision.HIGHEST
    S = memory_bank.shape[1]
    align = jnp.einsum('btd,bsd->bts', source, memory_bank, precision=hi)
    mask = (jnp.arange(S)[None, :] < memory_lengths[:, None])[:, None, :]   # [B,1,S]
    align = jnp.where(mask, align, -jnp.inf)
    align_vectors = jax.nn.softmax(align, axis=-1)
    c = jnp.einsum('bts,bsd->btd', align_vectors, memory_bank, precision=hi)
    concat = jnp.concatenate([c, source], axis=-1)                          # [B,T,2D]
    attn_h = jnp.tanh(jnp.einsum('btk,dk->btd', concat, linear_out_weight, precision=hi))
    return jnp.transpose(attn_h, (1, 0, 2)), jnp.transpose(align_vectors, (1, 0, 2))


if __name__ == "__main__":
    key = jax.random.PRNGKey(0)

    # --- test 1: module-like small shapes, exact f32 matmul path --------------
    B, T, S, D = 2, 4, 8, 32
    k1, k2, k3 = jax.random.split(key, 3)
    source = jax.random.normal(k1, (B, T, D), dtype=jnp.float32)
    memory_bank = jax.random.normal(k2, (B, S, D), dtype=jnp.float32)
    memory_lengths = jnp.array([5, 8], dtype=jnp.int32)
    bound = 1.0 / jnp.sqrt(2.0 * D)
    w = jax.random.uniform(k3, (D, 2 * D), minval=-bound, maxval=bound, dtype=jnp.float32)

    attn_h, align = global_attention_dot(source, memory_bank, memory_lengths, w,
                                         mxu_bf16=False)
    jax.block_until_ready((attn_h, align))
    ref_h, ref_a = _reference(source, memory_bank, memory_lengths, w)
    assert attn_h.shape == (T, B, D) and align.shape == (T, B, S)
    assert jnp.allclose(attn_h, ref_h, atol=2e-3, rtol=2e-3)
    assert jnp.allclose(align, ref_a, atol=2e-3, rtol=2e-3)

    # --- test 2: force the multi-chunk online-softmax memory path -------------
    B2, T2, S2, D2 = 3, 10, 40, 16
    k4, k5, k6 = jax.random.split(k3, 3)
    src2 = jax.random.normal(k4, (B2, T2, D2), dtype=jnp.float32)
    mem2 = jax.random.normal(k5, (B2, S2, D2), dtype=jnp.float32)
    len2 = jnp.array([40, 17, 3], dtype=jnp.int32)
    bound2 = 1.0 / jnp.sqrt(2.0 * D2)
    w2 = jax.random.uniform(k6, (D2, 2 * D2), minval=-bound2, maxval=bound2,
                            dtype=jnp.float32)
    attn2, align2 = global_attention_dot(src2, mem2, len2, w2,
                                         mxu_bf16=False, src_chunk=16)
    jax.block_until_ready((attn2, align2))
    ref2_h, ref2_a = _reference(src2, mem2, len2, w2)
    assert attn2.shape == (T2, B2, D2) and align2.shape == (T2, B2, S2)
    assert jnp.allclose(attn2, ref2_h, atol=2e-3, rtol=2e-3)
    assert jnp.allclose(align2, ref2_a, atol=2e-3, rtol=2e-3)

    # --- test 3: default fast path (bf16 MXU operands, f32 accumulation) ------
    attn3, align3 = global_attention_dot(source, memory_bank, memory_lengths, w)
    jax.block_until_ready((attn3, align3))
    # bf16 operands perturb numerics; compare loosely against the f32 reference.
    assert jnp.allclose(attn3, ref_h, atol=1e-1, rtol=1e-1)
    assert jnp.allclose(align3, ref_a, atol=1e-1, rtol=1e-1)

    print("KERNEL_OK")
</pallas_src>

<mosaic_0001>
module attributes {stable_mosaic.version = 11 : i64} {
  func.func @kernel(%arg0: i32, %arg1: i32, %arg2: i32, %arg3: memref<2xi32, #tpu.memory_space<smem>>, %arg4: memref<2x8x32xf32, #tpu.memory_space<vmem>>, %arg5: memref<2x8x32xf32, #tpu.memory_space<vmem>>, %arg6: memref<32x64xf32, #tpu.memory_space<vmem>>, %arg7: memref<8x64xf32, #tpu.memory_space<vmem>>, %arg8: memref<8x16xf32, #tpu.memory_space<vmem>>, %arg9: memref<1x2x8x8xf32, #tpu.memory_space<vmem>>, %arg10: memref<2x8x1xf32, #tpu.memory_space<vmem>>, %arg11: memref<2x8x1xf32, #tpu.memory_space<vmem>>, %arg12: memref<2x8x32xf32, #tpu.memory_space<vmem>>) attributes {dimension_semantics = [#tpu.dimension_semantics<parallel>, #tpu.dimension_semantics<parallel>, #tpu.dimension_semantics<arbitrary>], iteration_bounds = array<i64: 1, 1, 1>, scalar_prefetch = 1 : i64, scratch_operands = 4 : i64, tpu.core_type = #tpu.core_type<tc>, window_params = [{transform_indices = @transform_0, window_bounds = array<i64: 2, 8, 32>}, {transform_indices = @transform_1, window_bounds = array<i64: 2, 8, 32>}, {pipeline_mode = #tpu.pipeline_mode<synchronous>, transform_indices = @transform_2, window_bounds = array<i64: 32, 64>}, {transform_indices = @transform_3, window_bounds = array<i64: 8, 64>}, {transform_indices = @transform_4, window_bounds = array<i64: 8, 16>}]} {
    %c0_i32 = arith.constant 0 : i32
    %0 = arith.cmpi eq, %arg2, %c0_i32 : i32
    %1 = arith.extui %0 : i1 to i32
    %c0_i32_0 = arith.constant 0 : i32
    %2 = arith.cmpi ne, %1, %c0_i32_0 : i32
    scf.if %2 {
      %cst_66 = arith.constant 0xFF800000 : f32
      %106 = vector.broadcast %cst_66 : f32 to vector<2x8x1xf32>
      %c0_67 = arith.constant 0 : index
      %c0_68 = arith.constant 0 : index
      %c0_69 = arith.constant 0 : index
      %107 = vector.load %arg10[%c0_67, %c0_68, %c0_69] : memref<2x8x1xf32, #tpu.memory_space<vmem>>, vector<2x8x1xf32>
      tpu.vector_store %arg10[%c0_67, %c0_68, %c0_69], %106 {strides = array<i32>} : memref<2x8x1xf32, #tpu.memory_space<vmem>>, vector<2x8x1xf32>,
      %cst_70 = arith.constant 0.000000e+00 : f32
      %108 = vector.broadcast %cst_70 : f32 to vector<2x8x1xf32>
      %c0_71 = arith.constant 0 : index
      %c0_72 = arith.constant 0 : index
      %c0_73 = arith.constant 0 : index
      %109 = vector.load %arg11[%c0_71, %c0_72, %c0_73] : memref<2x8x1xf32, #tpu.memory_space<vmem>>, vector<2x8x1xf32>
      tpu.vector_store %arg11[%c0_71, %c0_72, %c0_73], %108 {strides = array<i32>} : memref<2x8x1xf32, #tpu.memory_space<vmem>>, vector<2x8x1xf32>,
      %cst_74 = arith.constant 0.000000e+00 : f32
      %110 = vector.broadcast %cst_74 : f32 to vector<2x8x32xf32>
      %c0_75 = arith.constant 0 : index
      %c0_76 = arith.constant 0 : index
      %c0_77 = arith.constant 0 : index
      %111 = vector.load %arg12[%c0_75, %c0_76, %c0_77] : memref<2x8x32xf32, #tpu.memory_space<vmem>>, vector<2x8x32xf32>
      tpu.vector_store %arg12[%c0_75, %c0_76, %c0_77], %110 {strides = array<i32>} : memref<2x8x32xf32, #tpu.memory_space<vmem>>, vector<2x8x32xf32>,
    } else {
    }
    %c8_i32 = arith.constant 8 : i32
    %3 = arith.muli %arg2, %c8_i32 : i32
    %4 = tpu.iota {dimensions = array<i32: 1>} : vector<8x8xi32>
    %5 = vector.broadcast %3 : i32 to vector<8x8xi32>
    %6 = arith.addi %5, %4 : vector<8x8xi32>
    %c0 = arith.constant 0 : index
    %c0_1 = arith.constant 0 : index
    %c0_2 = arith.constant 0 : index
    %7 = vector.load %arg4[%c0, %c0_1, %c0_2] : memref<2x8x32xf32, #tpu.memory_space<vmem>>, vector<1x8x32xf32>
    %8 = vector.shape_cast %7 : vector<1x8x32xf32> to vector<8x32xf32>
    %c0_3 = arith.constant 0 : index
    %c0_4 = arith.constant 0 : index
    %c0_5 = arith.constant 0 : index
    %9 = vector.load %arg5[%c0_3, %c0_4, %c0_5] : memref<2x8x32xf32, #tpu.memory_space<vmem>>, vector<1x8x32xf32>
    %10 = vector.shape_cast %9 : vector<1x8x32xf32> to vector<8x32xf32>
    %c2_i32 = arith.constant 2 : i32
    %11 = arith.muli %arg0, %c2_i32 : i32
    %c0_i32_6 = arith.constant 0 : i32
    %12 = arith.addi %11, %c0_i32_6 : i32
    %13 = arith.index_cast %12 : i32 to index
    %14 = memref.load %arg3[%13] : memref<2xi32, #tpu.memory_space<smem>>
    %cst = arith.constant dense<0.000000e+00> : vector<8x8xf32>
    %15 = tpu.matmul %8, %10, %cst {dimension_numbers = #tpu.dot_dimension_numbers<[1], [1], [0], [0], [0, 0, 1, 0], [], []>} : vector<8x32xf32>, vector<8x32xf32>, vector<8x8xf32> -> vector<8x8xf32>
    %16 = vector.broadcast %14 : i32 to vector<8x8xi32>
    %17 = arith.cmpi slt, %6, %16 : vector<8x8xi32>
    %cst_7 = arith.constant 0xFF800000 : f32
    %18 = vector.broadcast %cst_7 : f32 to vector<8x8xf32>
    %19 = arith.select %17, %15, %18 : vector<8x8xi1>, vector<8x8xf32>
    %20 = arith.index_cast %arg2 : i32 to index
    %c0_8 = arith.constant 0 : index
    %c0_9 = arith.constant 0 : index
    %c0_10 = arith.constant 0 : index
    %21 = vector.load %arg9[%20, %c0_8, %c0_9, %c0_10] : memref<1x2x8x8xf32, #tpu.memory_space<vmem>>, vector<1x1x8x8xf32>
    %22 = vector.shape_cast %21 : vector<1x1x8x8xf32> to vector<8x8xf32>
    %23 = vector.shape_cast %19 : vector<8x8xf32> to vector<1x1x8x8xf32>
    tpu.vector_store %arg9[%20, %c0_8, %c0_9, %c0_10], %23 {strides = array<i32>} : memref<1x2x8x8xf32, #tpu.memory_space<vmem>>, vector<1x1x8x8xf32>,
    %c0_11 = arith.constant 0 : index
    %c0_12 = arith.constant 0 : index
    %c0_13 = arith.constant 0 : index
    %24 = vector.load %arg10[%c0_11, %c0_12, %c0_13] : memref<2x8x1xf32, #tpu.memory_space<vmem>>, vector<1x8x1xf32>
    %25 = vector.shape_cast %24 : vector<1x8x1xf32> to vector<8x1xf32>
    %cst_14 = arith.constant dense<0xFF800000> : vector<8xf32>
    %26 = vector.multi_reduction <maximumf>, %19, %cst_14 [1] : vector<8x8xf32> to vector<8xf32>
    %27 = vector.shape_cast %26 : vector<8xf32> to vector<8x1xf32>
    %28 = arith.maximumf %25, %27 : vector<8x1xf32>
    %29 = arith.subf %25, %28 : vector<8x1xf32>
    %30 = math.exp %29 : vector<8x1xf32>
    %31 = vector.broadcast %28 : vector<8x1xf32> to vector<8x8xf32>
    %32 = arith.subf %19, %31 : vector<8x8xf32>
    %33 = math.exp %32 : vector<8x8xf32>
    %c0_15 = arith.constant 0 : index
    %c0_16 = arith.constant 0 : index
    %c0_17 = arith.constant 0 : index
    %34 = vector.load %arg11[%c0_15, %c0_16, %c0_17] : memref<2x8x1xf32, #tpu.memory_space<vmem>>, vector<1x8x1xf32>
    %35 = vector.shape_cast %34 : vector<1x8x1xf32> to vector<8x1xf32>
    %36 = arith.mulf %30, %35 : vector<8x1xf32>
    %cst_18 = arith.constant dense<0.000000e+00> : vector<8xf32>
    %37 = vector.multi_reduction <add>, %33, %cst_18 [1] : vector<8x8xf32> to vector<8xf32>
    %38 = vector.shape_cast %37 : vector<8xf32> to vector<8x1xf32>
    %39 = arith.addf %36, %38 : vector<8x1xf32>
    %c0_19 = arith.constant 0 : index
    %c0_20 = arith.constant 0 : index
    %c0_21 = arith.constant 0 : index
    %40 = vector.load %arg11[%c0_19, %c0_20, %c0_21] : memref<2x8x1xf32, #tpu.memory_space<vmem>>, vector<1x8x1xf32>
    %41 = vector.shape_cast %40 : vector<1x8x1xf32> to vector<8x1xf32>
    %42 = vector.shape_cast %39 : vector<8x1xf32> to vector<1x8x1xf32>
    tpu.vector_store %arg11[%c0_19, %c0_20, %c0_21], %42 {strides = array<i32>} : memref<2x8x1xf32, #tpu.memory_space<vmem>>, vector<1x8x1xf32>,
    %c0_22 = arith.constant 0 : index
    %c0_23 = arith.constant 0 : index
    %c0_24 = arith.constant 0 : index
    %43 = vector.load %arg12[%c0_22, %c0_23, %c0_24] : memref<2x8x32xf32, #tpu.memory_space<vmem>>, vector<1x8x32xf32>
    %44 = vector.shape_cast %43 : vector<1x8x32xf32> to vector<8x32xf32>
    %45 = vector.broadcast %30 : vector<8x1xf32> to vector<8x32xf32>
    %46 = arith.mulf %45, %44 : vector<8x32xf32>
    %cst_25 = arith.constant dense<0.000000e+00> : vector<8x32xf32>
    %47 = tpu.matmul %33, %10, %cst_25 {dimension_numbers = #tpu.dot_dimension_numbers<[1], [0], [0], [1], [0, 0, 1, 1], [], []>} : vector<8x8xf32>, vector<8x32xf32>, vector<8x32xf32> -> vector<8x32xf32>
    %48 = arith.addf %46, %47 : vector<8x32xf32>
    %c0_26 = arith.constant 0 : index
    %c0_27 = arith.constant 0 : index
    %c0_28 = arith.constant 0 : index
    %49 = vector.load %arg12[%c0_26, %c0_27, %c0_28] : memref<2x8x32xf32, #tpu.memory_space<vmem>>, vector<1x8x32xf32>
    %50 = vector.shape_cast %49 : vector<1x8x32xf32> to vector<8x32xf32>
    %51 = vector.shape_cast %48 : vector<8x32xf32> to vector<1x8x32xf32>
    tpu.vector_store %arg12[%c0_26, %c0_27, %c0_28], %51 {strides = array<i32>} : memref<2x8x32xf32, #tpu.memory_space<vmem>>, vector<1x8x32xf32>,
    %c0_29 = arith.constant 0 : index
    %c0_30 = arith.constant 0 : index
    %c0_31 = arith.constant 0 : index
    %52 = vector.load %arg10[%c0_29, %c0_30, %c0_31] : memref<2x8x1xf32, #tpu.memory_space<vmem>>, vector<1x8x1xf32>
    %53 = vector.shape_cast %52 : vector<1x8x1xf32> to vector<8x1xf32>
    %54 = vector.shape_cast %28 : vector<8x1xf32> to vector<1x8x1xf32>
    tpu.vector_store %arg10[%c0_29, %c0_30, %c0_31], %54 {strides = array<i32>} : memref<2x8x1xf32, #tpu.memory_space<vmem>>, vector<1x8x1xf32>,
    %c1 = arith.constant 1 : index
    %c0_32 = arith.constant 0 : index
    %c0_33 = arith.constant 0 : index
    %55 = vector.load %arg4[%c1, %c0_32, %c0_33] : memref<2x8x32xf32, #tpu.memory_space<vmem>>, vector<1x8x32xf32>
    %56 = vector.shape_cast %55 : vector<1x8x32xf32> to vector<8x32xf32>
    %c1_34 = arith.constant 1 : index
    %c0_35 = arith.constant 0 : index
    %c0_36 = arith.constant 0 : index
    %57 = vector.load %arg5[%c1_34, %c0_35, %c0_36] : memref<2x8x32xf32, #tpu.memory_space<vmem>>, vector<1x8x32xf32>
    %58 = vector.shape_cast %57 : vector<1x8x32xf32> to vector<8x32xf32>
    %c2_i32_37 = arith.constant 2 : i32
    %59 = arith.muli %arg0, %c2_i32_37 : i32
    %c1_i32 = arith.constant 1 : i32
    %60 = arith.addi %59, %c1_i32 : i32
    %61 = arith.index_cast %60 : i32 to index
    %62 = memref.load %arg3[%61] : memref<2xi32, #tpu.memory_space<smem>>
    %cst_38 = arith.constant dense<0.000000e+00> : vector<8x8xf32>
    %63 = tpu.matmul %56, %58, %cst_38 {dimension_numbers = #tpu.dot_dimension_numbers<[1], [1], [0], [0], [0, 0, 1, 0], [], []>} : vector<8x32xf32>, vector<8x32xf32>, vector<8x8xf32> -> vector<8x8xf32>
    %64 = vector.broadcast %62 : i32 to vector<8x8xi32>
    %65 = arith.cmpi slt, %6, %64 : vector<8x8xi32>
    %cst_39 = arith.constant 0xFF800000 : f32
    %66 = vector.broadcast %cst_39 : f32 to vector<8x8xf32>
    %67 = arith.select %65, %63, %66 : vector<8x8xi1>, vector<8x8xf32>
    %68 = arith.index_cast %arg2 : i32 to index
    %c1_40 = arith.constant 1 : index
    %c0_41 = arith.constant 0 : index
    %c0_42 = arith.constant 0 : index
    %69 = vector.load %arg9[%68, %c1_40, %c0_41, %c0_42] : memref<1x2x8x8xf32, #tpu.memory_space<vmem>>, vector<1x1x8x8xf32>
    %70 = vector.shape_cast %69 : vector<1x1x8x8xf32> to vector<8x8xf32>
    %71 = vector.shape_cast %67 : vector<8x8xf32> to vector<1x1x8x8xf32>
    tpu.vector_store %arg9[%68, %c1_40, %c0_41, %c0_42], %71 {strides = array<i32>} : memref<1x2x8x8xf32, #tpu.memory_space<vmem>>, vector<1x1x8x8xf32>,
    %c1_43 = arith.constant 1 : index
    %c0_44 = arith.constant 0 : index
    %c0_45 = arith.constant 0 : index
    %72 = vector.load %arg10[%c1_43, %c0_44, %c0_45] : memref<2x8x1xf32, #tpu.memory_space<vmem>>, vector<1x8x1xf32>
    %73 = vector.shape_cast %72 : vector<1x8x1xf32> to vector<8x1xf32>
    %cst_46 = arith.constant dense<0xFF800000> : vector<8xf32>
    %74 = vector.multi_reduction <maximumf>, %67, %cst_46 [1] : vector<8x8xf32> to vector<8xf32>
    %75 = vector.shape_cast %74 : vector<8xf32> to vector<8x1xf32>
    %76 = arith.maximumf %73, %75 : vector<8x1xf32>
    %77 = arith.subf %73, %76 : vector<8x1xf32>
    %78 = math.exp %77 : vector<8x1xf32>
    %79 = vector.broadcast %76 : vector<8x1xf32> to vector<8x8xf32>
    %80 = arith.subf %67, %79 : vector<8x8xf32>
    %81 = math.exp %80 : vector<8x8xf32>
    %c1_47 = arith.constant 1 : index
    %c0_48 = arith.constant 0 : index
    %c0_49 = arith.constant 0 : index
    %82 = vector.load %arg11[%c1_47, %c0_48, %c0_49] : memref<2x8x1xf32, #tpu.memory_space<vmem>>, vector<1x8x1xf32>
    %83 = vector.shape_cast %82 : vector<1x8x1xf32> to vector<8x1xf32>
    %84 = arith.mulf %78, %83 : vector<8x1xf32>
    %cst_50 = arith.constant dense<0.000000e+00> : vector<8xf32>
    %85 = vector.multi_reduction <add>, %81, %cst_50 [1] : vector<8x8xf32> to vector<8xf32>
    %86 = vector.shape_cast %85 : vector<8xf32> to vector<8x1xf32>
    %87 = arith.addf %84, %86 : vector<8x1xf32>
    %c1_51 = arith.constant 1 : index
    %c0_52 = arith.constant 0 : index
    %c0_53 = arith.constant 0 : index
    %88 = vector.load %arg11[%c1_51, %c0_52, %c0_53] : memref<2x8x1xf32, #tpu.memory_space<vmem>>, vector<1x8x1xf32>
    %89 = vector.shape_cast %88 : vector<1x8x1xf32> to vector<8x1xf32>
    %90 = vector.shape_cast %87 : vector<8x1xf32> to vector<1x8x1xf32>
    tpu.vector_store %arg11[%c1_51, %c0_52, %c0_53], %90 {strides = array<i32>} : memref<2x8x1xf32, #tpu.memory_space<vmem>>, vector<1x8x1xf32>,
    %c1_54 = arith.constant 1 : index
    %c0_55 = arith.constant 0 : index
    %c0_56 = arith.constant 0 : index
    %91 = vector.load %arg12[%c1_54, %c0_55, %c0_56] : memref<2x8x32xf32, #tpu.memory_space<vmem>>, vector<1x8x32xf32>
    %92 = vector.shape_cast %91 : vector<1x8x32xf32> to vector<8x32xf32>
    %93 = vector.broadcast %78 : vector<8x1xf32> to vector<8x32xf32>
    %94 = arith.mulf %93, %92 : vector<8x32xf32>
    %cst_57 = arith.constant dense<0.000000e+00> : vector<8x32xf32>
    %95 = tpu.matmul %81, %58, %cst_57 {dimension_numbers = #tpu.dot_dimension_numbers<[1], [0], [0], [1], [0, 0, 1, 1], [], []>} : vector<8x8xf32>, vector<8x32xf32>, vector<8x32xf32> -> vector<8x32xf32>
    %96 = arith.addf %94, %95 : vector<8x32xf32>
    %c1_58 = arith.constant 1 : index
    %c0_59 = arith.constant 0 : index
    %c0_60 = arith.constant 0 : index
    %97 = vector.load %arg12[%c1_58, %c0_59, %c0_60] : memref<2x8x32xf32, #tpu.memory_space<vmem>>, vector<1x8x32xf32>
    %98 = vector.shape_cast %97 : vector<1x8x32xf32> to vector<8x32xf32>
    %99 = vector.shape_cast %96 : vector<8x32xf32> to vector<1x8x32xf32>
    tpu.vector_store %arg12[%c1_58, %c0_59, %c0_60], %99 {strides = array<i32>} : memref<2x8x32xf32, #tpu.memory_space<vmem>>, vector<1x8x32xf32>,
    %c1_61 = arith.constant 1 : index
    %c0_62 = arith.constant 0 : index
    %c0_63 = arith.constant 0 : index
    %100 = vector.load %arg10[%c1_61, %c0_62, %c0_63] : memref<2x8x1xf32, #tpu.memory_space<vmem>>, vector<1x8x1xf32>
    %101 = vector.shape_cast %100 : vector<1x8x1xf32> to vector<8x1xf32>
    %102 = vector.shape_cast %76 : vector<8x1xf32> to vector<1x8x1xf32>
    tpu.vector_store %arg10[%c1_61, %c0_62, %c0_63], %102 {strides = array<i32>} : memref<2x8x1xf32, #tpu.memory_space<vmem>>, vector<1x8x1xf32>,
    %c0_i32_64 = arith.constant 0 : i32
    %103 = arith.cmpi eq, %arg2, %c0_i32_64 : i32
    %104 = arith.extui %103 : i1 to i32
    %c0_i32_65 = arith.constant 0 : i32
    %105 = arith.cmpi ne, %104, %c0_i32_65 : i32
    scf.if %105 {
      %c0_66 = arith.constant 0 : index
      %c0_67 = arith.constant 0 : index
      %106 = vector.load %arg6[%c0_66, %c0_67] : memref<32x64xf32, #tpu.memory_space<vmem>>, vector<32x32xf32>
      %c0_68 = arith.constant 0 : index
      %c32 = arith.constant 32 : index
      %107 = vector.load %arg6[%c0_68, %c32] : memref<32x64xf32, #tpu.memory_space<vmem>>, vector<32x32xf32>
      %c0_69 = arith.constant 0 : index
      %c0_70 = arith.constant 0 : index
      %c0_71 = arith.constant 0 : index
      %108 = vector.load %arg11[%c0_69, %c0_70, %c0_71] : memref<2x8x1xf32, #tpu.memory_space<vmem>>, vector<1x8x1xf32>
      %109 = vector.shape_cast %108 : vector<1x8x1xf32> to vector<8x1xf32>
      %cst_72 = arith.constant 1.000000e+00 : f32
      %110 = vector.broadcast %cst_72 : f32 to vector<8x1xf32>
      %111 = arith.divf %110, %109 : vector<8x1xf32>
      %c0_73 = arith.constant 0 : index
      %c0_74 = arith.constant 0 : index
      %c0_75 = arith.constant 0 : index
      %112 = vector.load %arg12[%c0_73, %c0_74, %c0_75] : memref<2x8x32xf32, #tpu.memory_space<vmem>>, vector<1x8x32xf32>
      %113 = vector.shape_cast %112 : vector<1x8x32xf32> to vector<8x32xf32>
      %114 = vector.broadcast %111 : vector<8x1xf32> to vector<8x32xf32>
      %115 = arith.mulf %113, %114 : vector<8x32xf32>
      %c0_76 = arith.constant 0 : index
      %c0_77 = arith.constant 0 : index
      %c0_78 = arith.constant 0 : index
      %116 = vector.load %arg4[%c0_76, %c0_77, %c0_78] : memref<2x8x32xf32, #tpu.memory_space<vmem>>, vector<1x8x32xf32>
      %117 = vector.shape_cast %116 : vector<1x8x32xf32> to vector<8x32xf32>
      %cst_79 = arith.constant dense<0.000000e+00> : vector<8x32xf32>
      %118 = tpu.matmul %115, %106, %cst_79 {dimension_numbers = #tpu.dot_dimension_numbers<[1], [1], [0], [0], [0, 0, 1, 0], [], []>} : vector<8x32xf32>, vector<32x32xf32>, vector<8x32xf32> -> vector<8x32xf32>
      %cst_80 = arith.constant dense<0.000000e+00> : vector<8x32xf32>
      %119 = tpu.matmul %117, %107, %cst_80 {dimension_numbers = #tpu.dot_dimension_numbers<[1], [1], [0], [0], [0, 0, 1, 0], [], []>} : vector<8x32xf32>, vector<32x32xf32>, vector<8x32xf32> -> vector<8x32xf32>
      %120 = arith.addf %118, %119 : vector<8x32xf32>
      %121 = math.tanh %120 : vector<8x32xf32>
      %c0_81 = arith.constant 0 : index
      %c0_82 = arith.constant 0 : index
      %122 = vector.load %arg7[%c0_81, %c0_82] : memref<8x64xf32, #tpu.memory_space<vmem>>, vector<8x32xf32>
      tpu.vector_store %arg7[%c0_81, %c0_82], %121 {strides = array<i32>} : memref<8x64xf32, #tpu.memory_space<vmem>>, vector<8x32xf32>,
      %c0_83 = arith.constant 0 : index
      %c0_84 = arith.constant 0 : index
      %c0_85 = arith.constant 0 : index
      %123 = vector.load %arg10[%c0_83, %c0_84, %c0_85] : memref<2x8x1xf32, #tpu.memory_space<vmem>>, vector<1x8x1xf32>
      %124 = vector.shape_cast %123 : vector<1x8x1xf32> to vector<8x1xf32>
      %c0_86 = arith.constant 0 : index
      %c0_87 = arith.constant 0 : index
      %c0_88 = arith.constant 0 : index
      %c0_89 = arith.constant 0 : index
      %125 = vector.load %arg9[%c0_86, %c0_87, %c0_88, %c0_89] : memref<1x2x8x8xf32, #tpu.memory_space<vmem>>, vector<1x1x8x8xf32>
      %126 = vector.shape_cast %125 : vector<1x1x8x8xf32> to vector<8x8xf32>
      %127 = vector.broadcast %124 : vector<8x1xf32> to vector<8x8xf32>
      %128 = arith.subf %126, %127 : vector<8x8xf32>
      %129 = math.exp %128 : vector<8x8xf32>
      %130 = vector.broadcast %111 : vector<8x1xf32> to vector<8x8xf32>
      %131 = arith.mulf %129, %130 : vector<8x8xf32>
      %c0_90 = arith.constant 0 : index
      %c0_91 = arith.constant 0 : index
      %132 = vector.load %arg8[%c0_90, %c0_91] : memref<8x16xf32, #tpu.memory_space<vmem>>, vector<8x8xf32>
      tpu.vector_store %arg8[%c0_90, %c0_91], %131 {strides = array<i32>} : memref<8x16xf32, #tpu.memory_space<vmem>>, vector<8x8xf32>,
      %c1_92 = arith.constant 1 : index
      %c0_93 = arith.constant 0 : index
      %c0_94 = arith.constant 0 : index
      %133 = vector.load %arg11[%c1_92, %c0_93, %c0_94] : memref<2x8x1xf32, #tpu.memory_space<vmem>>, vector<1x8x1xf32>
      %134 = vector.shape_cast %133 : vector<1x8x1xf32> to vector<8x1xf32>
      %cst_95 = arith.constant 1.000000e+00 : f32
      %135 = vector.broadcast %cst_95 : f32 to vector<8x1xf32>
      %136 = arith.divf %135, %134 : vector<8x1xf32>
      %c1_96 = arith.constant 1 : index
      %c0_97 = arith.constant 0 : index
      %c0_98 = arith.constant 0 : index
      %137 = vector.load %arg12[%c1_96, %c0_97, %c0_98] : memref<2x8x32xf32, #tpu.memory_space<vmem>>, vector<1x8x32xf32>
      %138 = vector.shape_cast %137 : vector<1x8x32xf32> to vector<8x32xf32>
      %139 = vector.broadcast %136 : vector<8x1xf32> to vector<8x32xf32>
      %140 = arith.mulf %138, %139 : vector<8x32xf32>
      %c1_99 = arith.constant 1 : index
      %c0_100 = arith.constant 0 : index
      %c0_101 = arith.constant 0 : index
      %141 = vector.load %arg4[%c1_99, %c0_100, %c0_101] : memref<2x8x32xf32, #tpu.memory_space<vmem>>, vector<1x8x32xf32>
      %142 = vector.shape_cast %141 : vector<1x8x32xf32> to vector<8x32xf32>
      %cst_102 = arith.constant dense<0.000000e+00> : vector<8x32xf32>
      %143 = tpu.matmul %140, %106, %cst_102 {dimension_numbers = #tpu.dot_dimension_numbers<[1], [1], [0], [0], [0, 0, 1, 0], [], []>} : vector<8x32xf32>, vector<32x32xf32>, vector<8x32xf32> -> vector<8x32xf32>
      %cst_103 = arith.constant dense<0.000000e+00> : vector<8x32xf32>
      %144 = tpu.matmul %142, %107, %cst_103 {dimension_numbers = #tpu.dot_dimension_numbers<[1], [1], [0], [0], [0, 0, 1, 0], [], []>} : vector<8x32xf32>, vector<32x32xf32>, vector<8x32xf32> -> vector<8x32xf32>
      %145 = arith.addf %143, %144 : vector<8x32xf32>
      %146 = math.tanh %145 : vector<8x32xf32>
      %c0_104 = arith.constant 0 : index
      %c32_105 = arith.constant 32 : index
      %147 = vector.load %arg7[%c0_104, %c32_105] : memref<8x64xf32, #tpu.memory_space<vmem>>, vector<8x32xf32>
      tpu.vector_store %arg7[%c0_104, %c32_105], %146 {strides = array<i32>} : memref<8x64xf32, #tpu.memory_space<vmem>>, vector<8x32xf32>,
      %c1_106 = arith.constant 1 : index
      %c0_107 = arith.constant 0 : index
      %c0_108 = arith.constant 0 : index
      %148 = vector.load %arg10[%c1_106, %c0_107, %c0_108] : memref<2x8x1xf32, #tpu.memory_space<vmem>>, vector<1x8x1xf32>
      %149 = vector.shape_cast %148 : vector<1x8x1xf32> to vector<8x1xf32>
      %c0_109 = arith.constant 0 : index
      %c1_110 = arith.constant 1 : index
      %c0_111 = arith.constant 0 : index
      %c0_112 = arith.constant 0 : index
      %150 = vector.load %arg9[%c0_109, %c1_110, %c0_111, %c0_112] : memref<1x2x8x8xf32, #tpu.memory_space<vmem>>, vector<1x1x8x8xf32>
      %151 = vector.shape_cast %150 : vector<1x1x8x8xf32> to vector<8x8xf32>
      %152 = vector.broadcast %149 : vector<8x1xf32> to vector<8x8xf32>
      %153 = arith.subf %151, %152 : vector<8x8xf32>
      %154 = math.exp %153 : vector<8x8xf32>
      %155 = vector.broadcast %136 : vector<8x1xf32> to vector<8x8xf32>
      %156 = arith.mulf %154, %155 : vector<8x8xf32>
      %c0_113 = arith.constant 0 : index
      %c8 = arith.constant 8 : index
      %157 = vector.load %arg8[%c0_113, %c8] : memref<8x16xf32, #tpu.memory_space<vmem>>, vector<8x8xf32>
      tpu.vector_store %arg8[%c0_113, %c8], %156 {strides = array<i32>} : memref<8x16xf32, #tpu.memory_space<vmem>>, vector<8x8xf32>,
    } else {
    }
    return
  }
  func.func @transform_0(%arg0: i32, %arg1: i32, %arg2: i32, %arg3: memref<2xi32, #tpu.memory_space<smem>>) -> (i32, i32, i32) {
    %c0_i32 = arith.constant 0 : i32
    %c0_i32_0 = arith.constant 0 : i32
    return %arg0, %arg1, %c0_i32 : i32, i32, i32
  }
  func.func @transform_1(%arg0: i32, %arg1: i32, %arg2: i32, %arg3: memref<2xi32, #tpu.memory_space<smem>>) -> (i32, i32, i32) {
    %c0_i32 = arith.constant 0 : i32
    %c0_i32_0 = arith.constant 0 : i32
    return %arg0, %arg2, %c0_i32 : i32, i32, i32
  }
  func.func @transform_2(%arg0: i32, %arg1: i32, %arg2: i32, %arg3: memref<2xi32, #tpu.memory_space<smem>>) -> (i32, i32) {
    %c0_i32 = arith.constant 0 : i32
    %c0_i32_0 = arith.constant 0 : i32
    %c0_i32_1 = arith.constant 0 : i32
    return %c0_i32, %c0_i32_0 : i32, i32
  }
  func.func @transform_3(%arg0: i32, %arg1: i32, %arg2: i32, %arg3: memref<2xi32, #tpu.memory_space<smem>>) -> (i32, i32) {
    %c0_i32 = arith.constant 0 : i32
    return %arg1, %arg0 : i32, i32
  }
  func.func @transform_4(%arg0: i32, %arg1: i32, %arg2: i32, %arg3: memref<2xi32, #tpu.memory_space<smem>>) -> (i32, i32) {
    %c0_i32 = arith.constant 0 : i32
    return %arg1, %arg0 : i32, i32
  }
}

</mosaic_0001>

<bundles_post_ra>
// kernel: tpu_custom_call.1
= control target key start
LH: loop header
LB: loop body
LE: loop exit
PB: predicated region body
PF: predicated region fallthrough
CT: control target
= control target key end

     0   :  { %s1453_s0 = inlined_call_operand.hbm [shape: s32[2], index: 0, kind: input, shape index: {}]   ;;  %s1454_s1 = inlined_call_operand.hbm [shape: f32[2,8,32], index: 1, kind: input, shape index: {}]   ;;  %s1455_s2 = inlined_call_operand.hbm [shape: f32[2,8,32], index: 2, kind: input, shape index: {}]   ;;  %s1456_s3 = inlined_call_operand.hbm [shape: f32[32,64], index: 3, kind: input, shape index: {}]   ;;  %s1457_s4 = inlined_call_operand.hbm [shape: f32[8,64], index: 4, kind: output, shape index: {0}]   ;;  %s1458_s5 = inlined_call_operand.hbm [shape: f32[8,16], index: 5, kind: output, shape index: {1}]  }
   0x1   :  { %s1094_s20 = scalar_lea.hbm %s1453_s0, 16 }
   0x2   :  { %p1095_p0 = scmp.ne.s32.totalorder %s1453_s0, %s1094_s20  ;;  %p1098_p1 = scmp.lt.u32.totalorder %s1094_s20, %s1453_s0 }
   0x4   :  { %p1100_p2 = pnand %p1098_p1, %p1095_p0 }
   0x6   :  { %1103 = shalt.err (!%p1100_p2)  }
   0x7   :  { %s1224_s25 = smov [#allocation7]  }
   0x8   :  { %12 = dma.hbm_to_smem %s1453_s0, 16, %s1224_s25, [#allocation6] }
   0x9   :  { %1214 = dma.done.wait [#allocation6], 16 }
   0xa   :  { %1215 = vsyncadd [#allocation6], 4294967280 }
   0xb   :  { %14 = sfence }
   0xc   :  { %15 = vsyncpa [#allocation9], 0 }
   0xd   :  { %16 = vsyncpa [#allocation12], 0 }
   0xe   :  { %17 = vsyncpa [#allocation10], 0 }
   0xf   :  { %18 = vsyncpa [#allocation16], 0  ;;  %s1225_s28 = smov [#allocation11]   ;;  %s1226_s30 = smov [#allocation8]  }
  0x10   :  { %s36_s29 = sshll.u32 %s1225_s28, 4  ;;  %s24_s6 = sshll.u32 %s1226_s30, 4  ;;  %s37_s29 = int_to_ptr.vmem [resolvable:$true] %s36_s29  ;;  %s1281_s6 = int_to_ptr.vmem [resolvable:$true] %s24_s6 }
  0x11   :  { %s1104_s9 = scalar_lea.hbm %s1455_s2, 256 }
  0x12   :  { %p1105_p3 = scmp.ne.s32.totalorder %s1455_s2, %s1104_s9  ;;  %p1108_p4 = scmp.lt.u32.totalorder %s1104_s9, %s1455_s2 }
  0x14   :  { %p1110_p5 = pnand %p1108_p4, %p1105_p3 }
  0x16   :  { %1113 = shalt.err (!%p1110_p5)
}
  0x17   :  { %s1114_s13 = scalar_lea.vmem %s37_s29, 256  ;;  %p1119_p7 = scmp.lt.s32.totalorder %s37_s29, %s37_s29 }
  0x18   :  { %p1115_p6 = scmp.ne.s32.totalorder %s37_s29, %s1114_s13  ;;  %p1120_p8 = scmp.lt.s32.totalorder %s1114_s13, %s1114_s13 }
  0x1a   :  { %p1121_p9 = por %p1120_p8, %p1119_p7 }
  0x1c   :  { %p1122_p10 = pnand %p1121_p9, %p1115_p6 }
  0x1e   :  { %1125 = shalt.err (!%p1122_p10)
}
  0x1f   :  { %s1227_s14 = smov 128   ;;  %s1228_s15 = smov 8  }
  0x20   :  { %42 = dma.hbm_to_vmem [thread:$0]  %s1455_s2, 256, %s37_s29, [#allocation12], %s1227_s14, %s1227_s14, %s1228_s15  }
  0x21   :  { %s1126_s20 = scalar_lea.hbm %s1454_s1, 256 }
  0x22   :  { %p1127_p11 = scmp.ne.s32.totalorder %s1454_s1, %s1126_s20  ;;  %p1130_p12 = scmp.lt.u32.totalorder %s1126_s20, %s1454_s1 }
  0x24   :  { %p1132_p13 = pnand %p1130_p12, %p1127_p11 }
  0x26   :  { %1135 = shalt.err (!%p1132_p13)
}
  0x27   :  { %s1136_s25 = scalar_lea.vmem %s1281_s6, 256  ;;  %p1141_p1 = scmp.lt.s32.totalorder %s1281_s6, %s1281_s6 }
  0x28   :  { %p1137_p0 = scmp.ne.s32.totalorder %s1281_s6, %s1136_s25  ;;  %p1142_p2 = scmp.lt.s32.totalorder %s1136_s25, %s1136_s25 }
  0x2a   :  { %p1143_p3 = por %p1142_p2, %p1141_p1 }
  0x2c   :  { %p1144_p4 = pnand %p1143_p3, %p1137_p0 }
  0x2e   :  { %1147 = shalt.err (!%p1144_p4)
}
  0x2f   :  { %30 = dma.hbm_to_vmem [thread:$0]  %s1454_s1, 256, %s1281_s6, [#allocation9], %s1227_s14, %s1227_s14, %s1228_s15  }
  0x30   :  { %s1229_s27 = smov [#allocation13]   ;;  %s1148_s7 = scalar_lea.hbm %s1456_s3, 512 }
  0x31   :  { %s48_s28 = sshll.u32 %s1229_s27, 4  ;;  %p1149_p5 = scmp.ne.s32.totalorder %s1456_s3, %s1148_s7  ;;  %s49_s28 = int_to_ptr.vmem [resolvable:$true] %s48_s28 }
  0x32   :  { %p1152_p6 = scmp.lt.u32.totalorder %s1148_s7, %s1456_s3 }
  0x34   :  { %p1154_p7 = pnand %p1152_p6, %p1149_p5 }
  0x36   :  { %1157 = shalt.err (!%p1154_p7)
}
  0x37   :  { %s1158_s11 = scalar_lea.vmem %s49_s28, 512  ;;  %p1163_p9 = scmp.lt.s32.totalorder %s49_s28, %s49_s28 }
  0x38   :  { %p1159_p8 = scmp.ne.s32.totalorder %s49_s28, %s1158_s11  ;;  %p1164_p10 = scmp.lt.s32.totalorder %s1158_s11, %s1158_s11 }
  0x3a   :  { %p1165_p11 = por %p1164_p10, %p1163_p9 }
  0x3c   :  { %p1166_p12 = pnand %p1165_p11, %p1159_p8 }
  0x3e   :  { %1169 = shalt.err (!%p1166_p12)
}
  0x3f   :  { %54 = dma.hbm_to_vmem [thread:$0]  %s1456_s3, 512, %s49_s28, [#allocation12], %s1227_s14, %s1227_s14, %s1228_s15  }
  0x40   :  { %1216 = dma.done.wait [#allocation9], 256  }
  0x41   :  { %1217 = vsyncadd [#allocation9], 4294967040 }
  0x42   :  { %1218 = dma.done.wait [#allocation12], 768  }
  0x43   :  { %1219 = vsyncadd [#allocation12], 4294966528  ;;  %vm73_vm0 = vcmask 261120   ;;  %v1230_v0 = vmov 0.0   ;;  %vm1231_vm1 = vmmov 0   ;;  %v82_v1 = vld [vmem:[#allocation11] sm:$0xff]  ;;  %v77_v4 = vlaneseq }
  0x44   :  { %947 = vmatprep.subr.mxu0 %v1230_v0  ;;  %74 = vst.msk [vmem:[#allocation5] sm:$0xff] %vm73_vm0, %v1230_v0  ;;  %75 = vst.msk [vmem:[#allocation5 + $0x8] sm:$0xff] %vm73_vm0, %v1230_v0  ;;  %949 = vmatprep.mubr.msk.f32.mxu0 %vm1231_vm1, %v1230_v0  ;;  %v1344_v2 = vld [vmem:[#allocation8] sm:$0xff]  ;;  %vm68_vm2 = vcmask 7168   ;;  %v1232_v3 = vmov -inf   ;;  %s84_s3 = sld [smem:[#allocation7]] }
  0x45   :  { %952 = vmatprep.subr.mxu1 %v1230_v0  ;;  %954 = vmatprep.mubr.msk.f32.mxu1 %vm1231_vm1, %v1230_v0  ;;  %69 = vst.msk [vmem:[#allocation3] sm:$0xff] %vm68_vm2, %v1232_v3  ;;  %70 = vst.msk [vmem:[#allocation3 + $0x8] sm:$0xff] %vm68_vm2, %v1232_v3  ;;  %v78_v5 = vand.u32 127, %v77_v4  ;;  %vm167_vm4 = vcmask 64512   ;;  %v1233_v11 = vmov 0   ;;  %v279_v16 = vld [vmem:[#allocation11 + $0x8] sm:$0xff] }
  0x46   :  { %948 = vmatpush3.xpose.msk.msra.mxu0 %vm73_vm0, %v82_v1  ;;  %953 = vmatpush3.msra.mxu1 %v82_v1  ;;  %71 = vst.msk [vmem:[#allocation4] sm:$0xff] %vm68_vm2, %v1230_v0  ;;  %72 = vst.msk [vmem:[#allocation4 + $0x8] sm:$0xff] %vm68_vm2, %v1230_v0  ;;  %v1364_v22 = vld [vmem:[#allocation8 + $0x8] sm:$0xff]  ;;  %s895_s12 = sld [smem:[#allocation7 + $0x1]]  ;;  %v476_v40 = vld [vmem:[#allocation13] sm:$0xff]  ;;  %s1234_s13 = smov 96  }
  0x47   :  { %957 = vmatprep.subr.mxu1 %v1230_v0  ;;  %962 = vmatprep.subr.mxu0 %v1230_v0  ;;  %v477_v41 = vld [vmem:[#allocation13 + $0x8] sm:$0xff]  ;;  %v478_v43 = vld [vmem:[#allocation13 + $0x10] sm:$0xff]  ;;  %v479_v44 = vld [vmem:[#allocation13 + $0x18] sm:$0xff]  ;;  %v1235_v55 = vmov 0.0|0.0   ;;  %vm859_vm7 = vcmask 130112   ;;  %s1236_s14 = smov [#allocation15]  }
  0x48   :  { %1062 = vset.pattern.permute.xlu0 %v1233_v11  ;;  %1063 = vset.pattern.permute.xlu1 %v1233_v11  ;;  %v1378_v42 = vpack.c.bf16 %v477_v41, %v476_v40  ;;  %v1380_v45 = vpack.c.bf16 %v479_v44, %v478_v43  ;;  %v1064_v52 = vpack.i.bf16 %v477_v41, %v476_v40  ;;  %vm1389_vm6 = vmpackc.low %vm73_vm0, %vm73_vm0  ;;  %s877_s16 = sshll.u32 %s1236_s14, 4  ;;  %s878_s16 = int_to_ptr.vmem [resolvable:$true] %s877_s16 }
  0x49   :  { %950 = vmatmul.mubr.msk.f32.vlgmr.msra.gmra.mrb[0].mxu0 %vm73_vm0, %v1344_v2  ;;  %v1069_v53 = vpack.i.bf16 %v479_v44, %v478_v43  ;;  %s1170_s17 = scalar_lea.vmem %s878_s16, 128  ;;  %p1175_p0 = scmp.lt.s32.totalorder %s878_s16, %s878_s16 }
  0x4a   :  { %964 = vmatprep.mubr.msk.f32.mxu0 %vm1231_vm1, %v1230_v0  ;;  %v162_v6 = vstv %s84_s3  ;;  %963 = vmatpush3.msra.mxu0 %v279_v16  ;;  %p1171_p13 = scmp.ne.s32.totalorder %s878_s16, %s1170_s17  ;;  %p1176_p1 = scmp.lt.s32.totalorder %s1170_s17, %s1170_s17 }
  0x4b   :  { %vm163_vm3 = vcmp.lt.s32.totalorder %v78_v5, %v162_v6  ;;  %1027 = vmatprep.subr.bf16.mxu0 %v1235_v55 }
  0x4c   :  { %v169_v12 = vld [vmem:[#allocation3] sm:$0xff]  ;;  %v358_v29 = vstv %s895_s12  ;;  %v365_v36 = vld [vmem:[#allocation3 + $0x8] sm:$0xff]  ;;  %p1177_p2 = por %p1176_p1, %p1175_p0 }
  0x4d   :  { %v185_v25 = vld [vmem:[#allocation4] sm:$0xff]  ;;  %vm359_vm5 = vcmp.lt.s32.totalorder %v78_v5, %v358_v29  ;;  %v382_v60 = vld [vmem:[#allocation4 + $0x8] sm:$0xff] }
  0x4e   :  { %p1178_p3 = pnand %p1177_p2, %p1171_p13 }
 0x11c   :  { %v158_v7 = vpop.f32.mrb[0].mxu0 }
 0x11d   :  { %v164_v8 = vsel %vm163_vm3, %v158_v7, -inf  ;;  %v951_v9 = vpop.f32.mrb[1].mxu0 }
 0x11e   :  { %168 = vst.msk [vmem:[#allocation2] sm:$0xff] %vm167_vm4, %v164_v8  ;;  %v170_v10 = vsel %vm167_vm4, %v164_v8, -inf }
 0x11f   :  { %171 = vmax.xlane.f32.xlu0 %v170_v10 }
 0x1ac   :  { %v172_v13 = vpop.xlane.xlu0 %171 }
 0x1ad   :  { %v173_v14 = vmax.f32 %v169_v12, %v172_v13  ;;  %v193_v13 = vld [vmem:[#allocation5] sm:$0xff] }
 0x1af   :  { %v174_v15 = vsub.f32 %v169_v12, %v173_v14  ;;  %275 = vst.msk [vmem:[#allocation3] sm:$0xff] %vm68_vm2, %v173_v14  ;;  %179 = vperm.xlu0 %1062, %v173_v14  }
 0x1b1   :  { %v175_v23 = vmul.f32 1.442695, %v174_v15 }
 0x1b6   :  { %v667_v59 = vld [vmem:[#allocation3] sm:$0xff] }
 0x22e   :  { %v180_v17 = vpop.permute.xlu0 %179 }
 0x22f   :  { %v182_v18 = vsub.f32 %v164_v8, %v180_v17 }
 0x231   :  { %v183_v19 = vmul.f32 1.442695, %v182_v18 }
 0x233   :  { %1074 = vpow2.f32 %v183_v19 }
 0x234   :  { %1076 = vpow2.f32 %v175_v23 }
 0x23d   :  { %v1075_v20 = vpop.eup %1074 }
 0x23e   :  { %955 = vmatmul.mubr.msk.f32.vlgmr.msra.gmra.mrb[0].mxu1 %vm167_vm4, %v1075_v20  ;;  %v187_v21 = vsel %vm167_vm4, %v1075_v20, 0.0  ;;  %v1077_v24 = vpop.eup %1076 }
 0x23f   :  { %958 = vmatpush3.xpose.msk.msra.mxu1 %vm73_vm0, %v279_v16  ;;  %188 = vadd.xlane.f32.xlu0 %v187_v21  ;;  %v186_v26 = vmul.f32 %v1077_v24, %v185_v25 }
 0x240   :  { %959 = vmatprep.mubr.msk.f32.mxu1 %vm1231_vm1, %v1230_v0  ;;  %1011 = vmatprep.subr.bf16.mxu1 %v1235_v55 }
 0x242   :  { %960 = vmatmul.mubr.msk.f32.vlgmr.msra.gmra.mrb[2].mxu1 %vm73_vm0, %v1364_v22 }
 0x243   :  { %975 = vmatprep.mubr.msk.f32.mxu1 %vm1231_vm1, %v1230_v0 }
 0x2cc   :  { %v189_v27 = vpop.xlane.xlu0 %188 }
 0x2cd   :  { %v190_v28 = vadd.f32 %v189_v27, %v186_v26 }
 0x2cf   :  { %192 = vst.msk [vmem:[#allocation4] sm:$0xff] %vm68_vm2, %v190_v28 }
 0x2d6   :  { %v480_v54 = vld [vmem:[#allocation4] sm:$0xff] }
 0x311   :  { %v1373_v30 = vpop.f32.mrb[0].mxu1 }
 0x312   :  { %v956_v31 = vpop.f32.mrb[1].mxu1 }
 0x315   :  { %v354_v32 = vpop.f32.mrb[2].mxu1 }
 0x316   :  { %v360_v33 = vsel %vm359_vm5, %v354_v32, -inf  ;;  %v961_v34 = vpop.f32.mrb[3].mxu1 }
 0x317   :  { %363 = vst.msk [vmem:[#allocation2 + $0x8] sm:$0xff] %vm167_vm4, %v360_v33  ;;  %v366_v35 = vsel %vm167_vm4, %v360_v33, -inf }
 0x318   :  { %367 = vmax.xlane.f32.xlu1 %v366_v35 }
 0x31e   :  { %v845_v31 = vld [vmem:[#allocation2 + $0x8] sm:$0xff] }
 0x3a5   :  { %v368_v37 = vpop.xlane.xlu1 %367 }
 0x3a6   :  { %v369_v38 = vmax.f32 %v365_v36, %v368_v37 }
 0x3a8   :  { %v370_v39 = vsub.f32 %v365_v36, %v369_v38  ;;  %472 = vst.msk [vmem:[#allocation3 + $0x8] sm:$0xff] %vm68_vm2, %v369_v38  ;;  %375 = vperm.xlu1 %1063, %v369_v38  }
 0x3aa   :  { %v371_v51 = vmul.f32 1.442695, %v370_v39 }
 0x3af   :  { %v843_v58 = vld [vmem:[#allocation3 + $0x8] sm:$0xff] }
 0x427   :  { %v376_v46 = vpop.permute.xlu1 %375 }
 0x428   :  { %v378_v47 = vsub.f32 %v360_v33, %v376_v46 }
 0x42a   :  { %v379_v48 = vmul.f32 1.442695, %v378_v47 }
 0x42c   :  { %1078 = vpow2.f32 %v379_v48 }
 0x42d   :  { %1080 = vpow2.f32 %v371_v51 }
 0x42e   :  { %1082 = vrcp.f32 %v480_v54 }
 0x436   :  { %v1079_v49 = vpop.eup %1078 }
 0x437   :  { %965 = vmatmul.mubr.msk.f32.vlgmr.msra.gmra.mrb[2].mxu0 %vm167_vm4, %v1079_v49  ;;  %v384_v50 = vsel %vm167_vm4, %v1079_v49, 0.0  ;;  %v1081_v56 = vpop.eup %1080 }
 0x438   :  { %385 = vadd.xlane.f32.xlu1 %v384_v50  ;;  %997 = vmatprep.mubr.msk.f32.mxu0 %vm1231_vm1, %v1230_v0  ;;  %v1083_v57 = vpop.eup %1082  ;;  %v383_v61 = vmul.f32 %v1081_v56, %v382_v60 }
 0x449   :  { %1065 = vrot.lane.b32.xlu1 %v1064_v52, %s1234_s13 }
 0x44d   :  { %1070 = vrot.lane.b32.xlu1 %v1069_v53, %s1234_s13 }
 0x451   :  { %393 = vperm.xlu1 %1063, %v1081_v56  }
 0x455   :  { %196 = vperm.xlu1 %1063, %v1077_v24  }
 0x459   :  { %486 = vperm.xlu1 %1063, %v1083_v57  }
 0x45d   :  { %848 = vperm.xlu1 %1063, %v843_v58  }
 0x461   :  { %671 = vperm.xlu1 %1063, %v667_v59  }
 0x4c5   :  { %v386_v62 = vpop.xlane.xlu1 %385 }
 0x4c6   :  { %v387_v63 = vadd.f32 %v386_v62, %v383_v61 }
 0x4c8   :  { %388 = vst.msk [vmem:[#allocation4 + $0x8] sm:$0xff] %vm68_vm2, %v387_v63 }
 0x4c9   :  { %v1066_v1 = vpop.permute.xlu1 %1065 }
 0x4ca   :  { %v1068_v3 = vunpack.i.h.bf16 %v1066_v1  ;;  %v1067_v4 = vunpack.i.l.bf16 %v1066_v1 }
 0x4cc   :  { %v1012_v6 = vpack.c.bf16 %v1068_v3, %v1067_v4 }
 0x4cd   :  { %v1071_v7 = vpop.permute.xlu1 %1070 }
 0x4ce   :  { %v1073_v8 = vunpack.i.h.bf16 %v1071_v7  ;;  %v1072_v9 = vunpack.i.l.bf16 %v1071_v7  ;;  %1014 = vmatpush3.bf16.xpose.msk.msra.mxu1 %vm1389_vm6, %v1012_v6  ;;  %1030 = vmatpush3.bf16.xpose.msk.msra.mxu0 %vm1389_vm6, %v1012_v6 }
 0x4cf   :  { %1015 = vmatprep.subr.bf16.mxu1 %v1235_v55  ;;  %v679_v10 = vld [vmem:[#allocation4 + $0x8] sm:$0xff]  ;;  %1031 = vmatprep.subr.bf16.mxu0 %v1235_v55 }
 0x4d0   :  { %1084 = vrcp.f32 %v679_v10  ;;  %v1016_v12 = vpack.c.bf16 %v1073_v8, %v1072_v9 }
 0x4d1   :  { %v394_v11 = vpop.permute.xlu1 %393 }
 0x4d5   :  { %v197_v14 = vpop.permute.xlu1 %196 }
 0x4d6   :  { %v199_v15 = vmul.f32 %v197_v14, %v193_v13  ;;  %1018 = vmatpush3.bf16.xpose.msk.msra.mxu1 %vm1389_vm6, %v1016_v12  ;;  %1034 = vmatpush3.bf16.xpose.msk.msra.mxu0 %vm1389_vm6, %v1016_v12 }
 0x4d7   :  { %1019 = vmatprep.subr.bf16.mxu1 %v1235_v55  ;;  %1035 = vmatprep.subr.bf16.mxu0 %v1235_v55 }
 0x4d8   :  { %v273_v16 = vadd.f32 %v1373_v30, %v199_v15 }
 0x4d9   :  { %v487_v17 = vpop.permute.xlu1 %486 }
 0x4da   :  { %v1085_v18 = vpop.eup %1084  ;;  %274 = vst.msk [vmem:[#allocation5] sm:$0xff] %vm73_vm0, %v273_v16 }
 0x4db   :  { %685 = vperm.xlu0 %1062, %v1085_v18  }
 0x4dd   :  { %v849_v19 = vpop.permute.xlu1 %848  ;;  %976 = vmatmul.mubr.msk.f32.vlgmr.msra.gmra.mrb[4].mxu1 %vm73_vm0, %v1344_v2  ;;  %998 = vmatmul.mubr.msk.f32.vlgmr.msra.gmra.mrb[4].mxu0 %vm73_vm0, %v1364_v22  ;;  %v668_v2 = vld [vmem:[#allocation2] sm:$0xff] }
 0x4de   :  { %1022 = vmatpush3.bf16.xpose.msk.msra.mxu1 %vm1389_vm6, %v1378_v42  ;;  %986 = vmatprep.mubr.msk.f32.mxu1 %vm1231_vm1, %v1230_v0  ;;  %v851_v32 = vsub.f32 %v845_v31, %v849_v19 }
 0x4df   :  { %1023 = vmatprep.subr.bf16.mxu1 %v1235_v55  ;;  %1038 = vmatpush3.bf16.xpose.msk.msra.mxu0 %vm1389_vm6, %v1378_v42 }
 0x4e0   :  { %1039 = vmatprep.subr.bf16.mxu0 %v1235_v55  ;;  %1008 = vmatprep.mubr.msk.f32.mxu0 %vm1231_vm1, %v1230_v0  ;;  %v390_v0 = vld [vmem:[#allocation5 + $0x8] sm:$0xff]  ;;  %v852_v33 = vmul.f32 1.442695, %v851_v32 }
 0x4e1   :  { %v672_v20 = vpop.permute.xlu1 %671  ;;  %v483_v23 = vld [vmem:[#allocation5] sm:$0xff]  ;;  %v396_v27 = vmul.f32 %v394_v11, %v390_v0 }
 0x4e2   :  { %v674_v21 = vsub.f32 %v668_v2, %v672_v20  ;;  %v489_v24 = vmul.f32 %v487_v17, %v483_v23 }
 0x4e4   :  { %v675_v22 = vmul.f32 1.442695, %v674_v21 }
 0x4e6   :  { %1086 = vpow2.f32 %v675_v22  ;;  %1026 = vmatpush3.bf16.xpose.msk.msra.mxu1 %vm1389_vm6, %v1380_v45 }
 0x4e7   :  { %1042 = vmatpush3.bf16.xpose.msk.msra.mxu0 %vm1389_vm6, %v1380_v45  ;;  %1088 = vpow2.f32 %v852_v33 }
 0x4ed   :  { %987 = vmatmul.mubr.msk.f32.vlgmr.msra.gmra.mrb[4].mxu1 %vm73_vm0, %v489_v24 }
 0x4f0   :  { %v1087_v25 = vpop.eup %1086 }
 0x4f1   :  { %v677_v26 = vmul.f32 %v1087_v25, %v487_v17  ;;  %v1089_v34 = vpop.eup %1088 }
 0x4f3   :  { %678 = vst.msk [vmem:[#allocation15] sm:$0xff] %vm167_vm4, %v677_v26 }
 0x50a   :  { %v466_v28 = vpop.f32.mrb[2].mxu0 }
 0x50b   :  { %v470_v29 = vadd.f32 %v466_v28, %v396_v27  ;;  %v966_v30 = vpop.f32.mrb[3].mxu0 }
 0x50d   :  { %471 = vst.msk [vmem:[#allocation5 + $0x8] sm:$0xff] %vm73_vm0, %v470_v29 }
 0x514   :  { %v682_v35 = vld [vmem:[#allocation5 + $0x8] sm:$0xff] }
 0x55a   :  { %v686_v36 = vpop.permute.xlu0 %685 }
 0x55b   :  { %v688_v37 = vmul.f32 %v686_v36, %v682_v35  ;;  %v854_v38 = vmul.f32 %v1089_v34, %v686_v36 }
 0x55d   :  { %1009 = vmatmul.mubr.msk.f32.vlgmr.msra.gmra.mrb[4].mxu0 %vm73_vm0, %v688_v37  ;;  %856 = vrot.lane.b32.xlu0 %v854_v38, %s1228_s15 }
 0x5c0   :  { %v661_v39 = vpop.f32.mrb[4].mxu1 }
 0x5c1   :  { %1090 = vtanh.f32 %v661_v39  ;;  %v988_v40 = vpop.f32.mrb[5].mxu1 }
 0x5cb   :  { %v1091_v41 = vpop.eup %1090 }
 0x5cc   :  { %666 = vst.msk [vmem:[#allocation14] sm:$0xff] %vm73_vm0, %v1091_v41 }
 0x5cf   :  { %v857_v42 = vpop.permute.xlu0 %856 }
 0x5d0   :  { %860 = vst.msk [vmem:[#allocation15] sm:$0xff] %vm859_vm7, %v857_v42 }
 0x630   :  { %v832_v43 = vpop.f32.mrb[4].mxu0 }
 0x631   :  { %1181 = shalt.err (!%p1178_p3)
}
 0x632   :  { %s1182_s19 = scalar_lea.hbm %s1458_s5, 128 }
 0x633   :  { %p1183_p4 = scmp.ne.s32.totalorder %s1458_s5, %s1182_s19  ;;  %p1186_p5 = scmp.lt.u32.totalorder %s1182_s19, %s1458_s5 }
 0x635   :  { %p1188_p6 = pnand %p1186_p5, %p1183_p4 }
 0x637   :  { %1191 = shalt.err (!%p1188_p6)
}
 0x638   :  { %880 = dma.vmem_to_hbm [thread:$0]  %s878_s16, 128, %s1458_s5, [#allocation16]   ;;  %1092 = vtanh.f32 %v832_v43  ;;  %v1010_v44 = vpop.f32.mrb[5].mxu0  ;;  %vm841_vm8 = vcmask 523520  }
 0x639   :  { %s1237_s2 = smov 32   ;;  %s1238_s26 = smov [#allocation14]  }
 0x63a   :  { %s867_s27 = sshll.u32 %s1238_s26, 4  ;;  %s868_s27 = int_to_ptr.vmem [resolvable:$true] %s867_s27 }
 0x63b   :  { %s1192_s28 = scalar_lea.vmem %s868_s27, 128  ;;  %p1197_p8 = scmp.lt.s32.totalorder %s868_s27, %s868_s27 }
 0x63c   :  { %p1193_p7 = scmp.ne.s32.totalorder %s868_s27, %s1192_s28  ;;  %p1198_p9 = scmp.lt.s32.totalorder %s1192_s28, %s1192_s28 }
 0x63e   :  { %p1199_p10 = por %p1198_p9, %p1197_p8 }
 0x640   :  { %p1200_p11 = pnand %p1199_p10, %p1193_p7 }
 0x642   :  { %v1093_v45 = vpop.eup %1092 }
 0x643   :  { %838 = vrot.lane.b32.xlu1 %v1093_v45, %s1237_s2 }
 0x6b5   :  { %v839_v46 = vpop.permute.xlu1 %838 }
 0x6b6   :  { %842 = vst.msk [vmem:[#allocation14] sm:$0xff] %vm841_vm8, %v839_v46 }
 0x6b7   :  { %1203 = shalt.err (!%p1200_p11)
}
 0x6b8   :  { %s1204_s30 = scalar_lea.hbm %s1457_s4, 128 }
 0x6b9   :  { %p1205_p12 = scmp.ne.s32.totalorder %s1457_s4, %s1204_s30  ;;  %p1208_p13 = scmp.lt.u32.totalorder %s1204_s30, %s1457_s4 }
 0x6bb   :  { %p1210_p0 = pnand %p1208_p13, %p1205_p12 }
 0x6bd   :  { %1213 = shalt.err (!%p1210_p0)
}
 0x6be   :  { %870 = dma.vmem_to_hbm [thread:$0]  %s868_s27, 128, %s1457_s4, [#allocation10]  }
 0x6bf   :  { %1220 = dma.done.wait [#allocation10], 128  }
 0x6c0   :  { %1221 = vsyncadd [#allocation10], 4294967168 }
 0x6c1   :  { %1222 = dma.done.wait [#allocation16], 128  }
 0x6c2   :  { %1223 = vsyncadd [#allocation16], 4294967168 }
 0x6c3   :  { %887 = vsyncpa [#allocation9], 1 }
 0x6c4   :  { %888 = vsyncpa [#allocation12], 1 }
 0x6c5   :  { %889 = vsyncpa [#allocation10], 1 }
 0x6c6   :  { %890 = vsyncpa [#allocation16], 1 }

</bundles_post_ra>
